<compile_context>
chip_gen: v5e
topology: v5e:2x2
jax: 0.10.0
libtpu: 0.0.40
codegen_flags: <defaults>
</compile_context>

<pallas_src>
import math

import jax
import jax.numpy as jnp
from jax.experimental import pallas as pl
from jax.experimental.pallas import tpu as pltpu


# -----------------------------------------------------------------------------
# Small helpers: padded (real) VMEM footprints and generation-aware budgets
# -----------------------------------------------------------------------------

def _round_up(x, m):
    return ((x + m - 1) // m) * m


def _sublane_multiple(dtype):
    # 32-bit -> 8 sublanes, 16-bit -> 16, 8-bit -> 32 (packed along sublanes).
    return {4: 8, 2: 16, 1: 32}.get(jnp.dtype(dtype).itemsize, 8)


def _padded_block_bytes(shape, dtype):
    """Real VMEM bytes of a block: last dim padded to 128 lanes,
    second-to-last padded to the dtype's sublane multiple."""
    d = jnp.dtype(dtype)
    if len(shape) < 2:
        n = int(shape[0]) if shape else 1
        return _round_up(n * d.itemsize, 512)
    lead = 1
    for s in shape[:-2]:
        lead *= int(s)
    sub = _round_up(int(shape[-2]), _sublane_multiple(d))
    lane = _round_up(int(shape[-1]), 128)
    return lead * sub * lane * d.itemsize


def _vmem_budget_bytes():
    """Generation-aware usable scoped-VMEM budget."""
    try:
        cap = int(pltpu.get_tpu_info().vmem_capacity_bytes)
    except Exception:
        cap = 64 << 20  # conservative default: v7x-class 64 MiB per-core VMEM
    # ~50 MiB on 64 MiB parts (v7x), ~100 MiB on 128 MiB parts (v5e/v6e).
    return max(24 << 20, min(int(cap * 0.8), cap - (12 << 20)))


def _vmem_limit_bytes(padded_use, budget):
    want = padded_use + (8 << 20)
    return int(min(budget, max(want, 32 << 20)))


# -----------------------------------------------------------------------------
# Kernels
# -----------------------------------------------------------------------------

def _channel_grid_kernel(x_ref, w_ref, b_ref, o_ref):
    """Small-batch path: one grid step = one timestamp channel.

    x_ref: (1, B, seq_len)          channel-major view of the (tiny) input
    w_ref: (1, seq_len, d_model)    pre-transposed weights -> plain matmul
    b_ref: (1, 1, d_model)
    o_ref: (1, B, d_model)
    """
    x = x_ref[0].astype(w_ref.dtype)                       # (B, seq_len)
    acc = jnp.dot(x, w_ref[0], preferred_element_type=jnp.float32)
    o_ref[0] = (acc + b_ref[0].astype(jnp.float32)).astype(o_ref.dtype)


def _batch_tile_kernel(x_ref, w_ref, b_ref, o_ref):
    """Large-batch path: one grid step = one batch tile, native layouts.

    x_ref: (tb, time_c, seq_len)        native input layout
    w_ref: (time_c, seq_len, d_model)   full weights, resident (constant index)
    b_ref: (time_c, 1, d_model)         full bias, resident
    o_ref: (tb, time_c, d_model)        native output layout
    """
    time_c = w_ref.shape[0]
    x_all = x_ref[...]                                     # small vs weights/out
    b_all = b_ref[...].astype(jnp.float32)                 # (time_c, 1, d_model)
    # time_c is a handful of timestamp channels -> unroll at trace time.
    # TODO(synk): switch to lax.fori_loop(..., unroll=True) if time_c grows large.
    for c in range(time_c):
        x_c = x_all[:, c, :].astype(w_ref.dtype)           # (tb, seq_len)
        acc = jnp.dot(x_c, w_ref[c], preferred_element_type=jnp.float32)
        o_ref[:, c, :] = (acc + b_all[c]).astype(o_ref.dtype)


# -----------------------------------------------------------------------------
# Wrapper
# -----------------------------------------------------------------------------

def timestamp_embedding_forward(time_stamp, weights, biases, *,
                                out_dtype=None, force_path=None):
    """time_stamp: [B, time_c, seq_len]
    weights:      [time_c, seq_len, d_model]  -- pre-transposed ONCE offline from
                  PyTorch's per-channel nn.Linear weight [d_model, seq_len]
                  (weights[c] == W_torch[c].T)
    biases:       [time_c, d_model]
    out_dtype:    optional reduced-precision output (e.g. bf16) for the
                  write-bound large-batch regime.
    returns:      [B, time_c, d_model] with out[:, c, :] = x[:, c, :] @ weights[c] + biases[c]
    """
    B, time_c, seq_len = time_stamp.shape
    tc_w, seq_len_w, d_model = weights.shape
    assert tc_w == time_c and seq_len_w == seq_len
    assert biases.shape == (time_c, d_model)

    out_dtype = jnp.dtype(out_dtype) if out_dtype is not None else time_stamp.dtype
    bias3 = biases.reshape(time_c, 1, d_model)

    x_bytes = time_stamp.size * time_stamp.dtype.itemsize
    w_bytes = weights.size * weights.dtype.itemsize
    b_bytes = biases.size * biases.dtype.itemsize
    o_bytes = B * time_c * d_model * out_dtype.itemsize
    cost = pl.CostEstimate(
        flops=2 * B * time_c * seq_len * d_model,
        transcendentals=0,
        bytes_accessed=x_bytes + w_bytes + b_bytes + o_bytes,
    )

    budget = _vmem_budget_bytes()

    use_channel_grid = (force_path == "channel") or (
        force_path is None and B < 64 and time_c >= 2)

    if use_channel_grid:
        # ---- Small-batch path: grid over the time_c channels ----------------
        # Weights stay in their (pre-transposed) native layout; only the tiny
        # x / out arrays are viewed channel-major so each block is a dense
        # [B, *] slab.  >= 2 "parallel" grid steps pipeline the weight stream
        # (the dominant HBM traffic at small B) and feed both v7x TensorCores.
        x_cm = jnp.transpose(time_stamp, (1, 0, 2))        # [time_c, B, seq_len]

        padded_use = 2 * (
            _padded_block_bytes((1, B, seq_len), time_stamp.dtype)
            + _padded_block_bytes((1, seq_len, d_model), weights.dtype)
            + _padded_block_bytes((1, 1, d_model), biases.dtype)
            + _padded_block_bytes((1, B, d_model), out_dtype))

        out_cm = pl.pallas_call(
            _channel_grid_kernel,
            out_shape=jax.ShapeDtypeStruct((time_c, B, d_model), out_dtype),
            grid_spec=pltpu.PrefetchScalarGridSpec(
                num_scalar_prefetch=0,
                grid=(time_c,),
                in_specs=[
                    pl.BlockSpec((1, B, seq_len), lambda c: (c, 0, 0)),
                    pl.BlockSpec((1, seq_len, d_model), lambda c: (c, 0, 0)),
                    pl.BlockSpec((1, 1, d_model), lambda c: (c, 0, 0)),
                ],
                out_specs=pl.BlockSpec((1, B, d_model), lambda c: (c, 0, 0)),
            ),
            compiler_params=pltpu.CompilerParams(
                dimension_semantics=("parallel",),
                vmem_limit_bytes=_vmem_limit_bytes(padded_use, budget),
            ),
            cost_estimate=cost,
        )(x_cm, weights, bias3)
        return jnp.transpose(out_cm, (1, 0, 2))            # [B, time_c, d_model]

    # ---- Large-batch path: batch-tiled grid on fully native layouts ---------
    # Full weights + bias resident (constant index maps -> fetched once),
    # x / out streamed in native [B, time_c, *] layouts: no wrapper transposes,
    # so the dominant output stream is written exactly once (lane-dense when
    # d_model % 128 == 0).
    w_block_bytes = _padded_block_bytes((time_c, seq_len, d_model), weights.dtype)
    b_block_bytes = _padded_block_bytes((time_c, 1, d_model), biases.dtype)
    x_row_bytes = _padded_block_bytes((1, time_c, seq_len), time_stamp.dtype)
    o_row_bytes = _padded_block_bytes((1, time_c, d_model), out_dtype)

    headroom = 6 << 20
    avail = budget - 2 * (w_block_bytes + b_block_bytes) - headroom
    per_row = 2 * (x_row_bytes + o_row_bytes)              # double-buffered x/out
    tb_budget = max(8, (max(avail, per_row * 8) // per_row) // 8 * 8)

    tb = min(tb_budget, 1024)
    if tb >= B:
        # Keep >= 2 grid steps so the DMA stream overlaps compute and v7x
        # megacore has work for both TensorCores.
        tb = max(8, _round_up(pl.cdiv(B, 2), 8)) if B > 8 else max(B, 1)
    tb = max(1, min(tb, tb_budget))

    padded_use = 2 * (w_block_bytes + b_block_bytes) + tb * per_row
    grid = (pl.cdiv(B, tb),)

    return pl.pallas_call(
        _batch_tile_kernel,
        out_shape=jax.ShapeDtypeStruct((B, time_c, d_model), out_dtype),
        grid_spec=pltpu.PrefetchScalarGridSpec(
            num_scalar_prefetch=0,
            grid=grid,
            in_specs=[
                pl.BlockSpec((tb, time_c, seq_len), lambda b: (b, 0, 0)),
                pl.BlockSpec((time_c, seq_len, d_model), lambda b: (0, 0, 0)),
                pl.BlockSpec((time_c, 1, d_model), lambda b: (0, 0, 0)),
            ],
            out_specs=pl.BlockSpec((tb, time_c, d_model), lambda b: (b, 0, 0)),
        ),
        compiler_params=pltpu.CompilerParams(
            dimension_semantics=("parallel",),
            vmem_limit_bytes=_vmem_limit_bytes(padded_use, budget),
        ),
        cost_estimate=cost,
    )(time_stamp, weights, bias3)


def init_params(key, time_c, seq_len, d_model):
    """Synthetic init mimicking per-channel nn.Linear(seq_len, d_model).

    Weights are produced directly in the kernel's layout [time_c, seq_len, d_model]
    (i.e. the one-time OFFLINE transpose of PyTorch's [d_model, seq_len] weight),
    so out[:, c, :] = x[:, c, :] @ weights[c] + biases[c].
    """
    kw, kb = jax.random.split(key)
    bound = 1.0 / math.sqrt(seq_len)
    weights = jax.random.uniform(
        kw, (time_c, seq_len, d_model), jnp.float32, minval=-bound, maxval=bound)
    biases = jax.random.uniform(
        kb, (time_c, d_model), jnp.float32, minval=-bound, maxval=bound)
    return weights, biases


if __name__ == "__main__":
    # d_model a multiple of 128 so output stores are lane-dense (unmasked vst).
    B, time_c, seq_len, d_model = 2, 4, 8, 128

    key = jax.random.PRNGKey(0)
    k_x, k_p = jax.random.split(key)
    time_stamp = jax.random.normal(k_x, (B, time_c, seq_len), jnp.float32)
    weights, biases = init_params(k_p, time_c, seq_len, d_model)

    def ref_forward(x, w, b):
        return jnp.stack(
            [x[:, c, :] @ w[c] + b[c] for c in range(w.shape[0])], axis=1)

    # 1) Small-batch path: channel grid, pipelined + "parallel", f32.
    out = jax.block_until_ready(
        timestamp_embedding_forward(time_stamp, weights, biases))
    ref = ref_forward(time_stamp, weights, biases)
    assert out.shape == (B, time_c, d_model)
    assert jnp.allclose(out, ref, atol=1e-5, rtol=1e-5)

    # 2) bf16 weights (halves the weight HBM stream), f32 MXU accumulation.
    out_bf16 = jax.block_until_ready(
        timestamp_embedding_forward(time_stamp, weights.astype(jnp.bfloat16), biases))
    assert jnp.allclose(out_bf16, ref, atol=1e-1, rtol=1e-1)

    # 3) Large-batch path: batch-tiled grid, native layouts, resident weights.
    B2, tc2, sl2, dm2 = 160, 5, 24, 256
    k_x2, k_p2 = jax.random.split(jax.random.PRNGKey(1))
    x2 = jax.random.normal(k_x2, (B2, tc2, sl2), jnp.float32)
    w2, b2 = init_params(k_p2, tc2, sl2, dm2)
    out2 = jax.block_until_ready(timestamp_embedding_forward(x2, w2, b2))
    ref2 = ref_forward(x2, w2, b2)
    assert out2.shape == (B2, tc2, dm2)
    assert jnp.allclose(out2, ref2, atol=1e-4, rtol=1e-4)

    print("KERNEL_OK")
</pallas_src>

<mosaic_0001>
module attributes {stable_mosaic.version = 11 : i64} {
  func.func @_channel_grid_kernel(%arg0: i32, %arg1: memref<1x2x8xf32, #tpu.memory_space<vmem>>, %arg2: memref<1x8x128xf32, #tpu.memory_space<vmem>>, %arg3: memref<1x1x128xf32, #tpu.memory_space<vmem>>, %arg4: memref<1x2x128xf32, #tpu.memory_space<vmem>>) attributes {dimension_semantics = [#tpu.dimension_semantics<parallel>], iteration_bounds = array<i64: 4>, scalar_prefetch = 0 : i64, scratch_operands = 0 : i64, tpu.core_type = #tpu.core_type<tc>, window_params = [{transform_indices = @transform_0, window_bounds = array<i64: 1, 2, 8>}, {transform_indices = @transform_1, window_bounds = array<i64: 1, 8, 128>}, {transform_indices = @transform_2, window_bounds = array<i64: 1, 1, 128>}, {transform_indices = @transform_3, window_bounds = array<i64: 1, 2, 128>}]} {
    %c0 = arith.constant 0 : index
    %c0_0 = arith.constant 0 : index
    %c0_1 = arith.constant 0 : index
    %0 = vector.load %arg1[%c0, %c0_0, %c0_1] : memref<1x2x8xf32, #tpu.memory_space<vmem>>, vector<1x2x8xf32>
    %1 = vector.shape_cast %0 : vector<1x2x8xf32> to vector<2x8xf32>
    %c0_2 = arith.constant 0 : index
    %c0_3 = arith.constant 0 : index
    %c0_4 = arith.constant 0 : index
    %2 = vector.load %arg2[%c0_2, %c0_3, %c0_4] : memref<1x8x128xf32, #tpu.memory_space<vmem>>, vector<1x8x128xf32>
    %3 = vector.shape_cast %2 : vector<1x8x128xf32> to vector<8x128xf32>
    %cst = arith.constant dense<0.000000e+00> : vector<2x128xf32>
    %4 = tpu.matmul %1, %3, %cst {dimension_numbers = #tpu.dot_dimension_numbers<[1], [0], [0], [1], [0, 0, 1, 1], [], []>} : vector<2x8xf32>, vector<8x128xf32>, vector<2x128xf32> -> vector<2x128xf32>
    %c0_5 = arith.constant 0 : index
    %c0_6 = arith.constant 0 : index
    %c0_7 = arith.constant 0 : index
    %5 = vector.load %arg3[%c0_5, %c0_6, %c0_7] : memref<1x1x128xf32, #tpu.memory_space<vmem>>, vector<1x1x128xf32>
    %6 = vector.shape_cast %5 : vector<1x1x128xf32> to vector<1x128xf32>
    %7 = vector.broadcast %6 : vector<1x128xf32> to vector<2x128xf32>
    %8 = arith.addf %4, %7 : vector<2x128xf32>
    %c0_8 = arith.constant 0 : index
    %c0_9 = arith.constant 0 : index
    %c0_10 = arith.constant 0 : index
    %9 = vector.load %arg4[%c0_8, %c0_9, %c0_10] : memref<1x2x128xf32, #tpu.memory_space<vmem>>, vector<1x2x128xf32>
    %10 = vector.shape_cast %9 : vector<1x2x128xf32> to vector<2x128xf32>
    %11 = vector.shape_cast %8 : vector<2x128xf32> to vector<1x2x128xf32>
    tpu.vector_store %arg4[%c0_8, %c0_9, %c0_10], %11 {strides = array<i32>} : memref<1x2x128xf32, #tpu.memory_space<vmem>>, vector<1x2x128xf32>,
    return
  }
  func.func @transform_0(%arg0: i32) -> (i32, i32, i32) {
    %c0_i32 = arith.constant 0 : i32
    %c0_i32_0 = arith.constant 0 : i32
    %c0_i32_1 = arith.constant 0 : i32
    return %arg0, %c0_i32, %c0_i32_0 : i32, i32, i32
  }
  func.func @transform_1(%arg0: i32) -> (i32, i32, i32) {
    %c0_i32 = arith.constant 0 : i32
    %c0_i32_0 = arith.constant 0 : i32
    %c0_i32_1 = arith.constant 0 : i32
    return %arg0, %c0_i32, %c0_i32_0 : i32, i32, i32
  }
  func.func @transform_2(%arg0: i32) -> (i32, i32, i32) {
    %c0_i32 = arith.constant 0 : i32
    %c0_i32_0 = arith.constant 0 : i32
    %c0_i32_1 = arith.constant 0 : i32
    return %arg0, %c0_i32, %c0_i32_0 : i32, i32, i32
  }
  func.func @transform_3(%arg0: i32) -> (i32, i32, i32) {
    %c0_i32 = arith.constant 0 : i32
    %c0_i32_0 = arith.constant 0 : i32
    %c0_i32_1 = arith.constant 0 : i32
    return %arg0, %c0_i32, %c0_i32_0 : i32, i32, i32
  }
}

</mosaic_0001>

<bundles_post_ra>
// kernel: tpu_custom_call.1
= control target key start
LH: loop header
LB: loop body
LE: loop exit
PB: predicated region body
PF: predicated region fallthrough
CT: control target
= control target key end

     0   :  { %s844_s0 = inlined_call_operand.hbm [shape: f32[4,2,8], index: 0, kind: input, shape index: {}]   ;;  %s845_s1 = inlined_call_operand.hbm [shape: f32[4,8,128], index: 1, kind: input, shape index: {}]   ;;  %s846_s2 = inlined_call_operand.hbm [shape: f32[4,1,128], index: 2, kind: input, shape index: {}]   ;;  %s847_s3 = inlined_call_operand.hbm [shape: f32[4,2,128], index: 3, kind: output, shape index: {}]  }
   0x1   :  { %848 = sst [smem:[#allocation12_spill]] %s845_s1 }
   0x2   :  { %8 = vsyncpa [#allocation3], 0 }
   0x3   :  { %10 = vsyncpa [#allocation3 + $0x1], 0 }
   0x4   :  { %11 = vsyncpa [#allocation6], 0 }
   0x5   :  { %13 = vsyncpa [#allocation6 + $0x1], 0 }
   0x6   :  { %14 = vsyncpa [#allocation4], 0 }
   0x7   :  { %16 = vsyncpa [#allocation4 + $0x1], 0  ;;  %s670_s12 = smov 0   ;;  %s672_s13 = smov 0  }
   0x8   :  { %s674_s14 = smov 0   ;;  %s676_s15 = smov 0  }
   0x9 LB: > { %s691_s16 = sadd.s32 4294967295, %s648_s15   ;;  %s415_s17 = sadd.s32 4294967294, %s648_s15   ;;  %s648_s15 = sphi %s676_s15, %s858_s15   ;;  %s644_s14 = sphi %s674_s14, %s857_s14   ;;  %s640_s13 = sphi %s672_s13, %s856_s13   ;;  %s636_s12 = sphi %s670_s12, %s855_s12  }
   0xa   : > { %s695_s18 = sadd.s32 1, %s648_s15   ;;  %s29_s19 = sadd.s32 1, %s644_s14 }
   0xb   : > { %s26_s20 = ssub.s32 %s648_s15, %s695_s18  ;;  %p36_p0 = scmp.ne.s32.totalorder %s644_s14, %s640_s13 }
   0xc   : > { %p27_p1 = scmp.eq.s32.totalorder %s26_s20, 0  ;;  %p37_p2 = scmp.eq.s32.totalorder %s648_s15, 0 }
   0xd   : > { %p42_p3 = scmp.ne.s32.totalorder %s640_s13, %s636_s12  ;;  %p43_p4 = scmp.eq.s32.totalorder %s691_s16, 0 }
   0xe   : > { %s707_s21 = scalar_select %p27_p1, %s644_s14, %s29_s19  }
   0xf   : > { %p38_p5 = por %p37_p2, %p36_p0  ;;  %p709_p6 = por %p43_p4, %p42_p3 }
  0x10   : > { %p118_p7 = scmp.eq.s32.totalorder %s691_s16, 3  ;;  %p124_p8 = scmp.eq.s32.totalorder %s415_s17, 3 }
  0x11   : > { %p453_p9 = scmp.lt.s32.totalorder %s648_s15, 4  ;;  %s724_s25 = sand.u32 1, %s644_s14  }
  0x12   : > { %p715_p10 = por %p118_p7, %p36_p0  ;;  %p719_p11 = por %p124_p8, %p42_p3 }
  0x13   : > { %p726_p12 = pnand %p453_p9, %p38_p5  ;;  %s163_s27 = sand.u32 1, %s648_s15  }
  0x14   : > { %s420_s28 = sshll.u32 %s724_s25, 3  ;;  %s421_s29 = sshll.u32 %s648_s15, 3 }
  0x15   : > { %s853_s1 = sld [smem:[#allocation12_spill]]  ;;  %s167_s6 = scalar_lea.vmem [#allocation5], %s420_s28 }
  0x16   : > { %s175_s7 = sshll.u32 %s167_s6, 4  ;;  %p422_p13 = scmp.ge.s32.totalorder %s648_s15, 1  ;;  %s176_s7 = int_to_ptr.vmem [resolvable:$true] %s175_s7 }
  0x17   : > { %s737_s9 = scalar_lea.sflag [#allocation6], %s163_s27  ;;  %p492_p1 = pneg %p726_p12 }
  0x1b   : > { %s171_s5 = scalar_lea.hbm %s853_s1, %s421_s29  ;;  %s495_s20 = scalar_lea.hbm %s853_s1, 32 }
  0x1c   : > { %s173_s8 = sshll.u32 %s171_s5, 4  ;;  %s174_s8 = int_to_ptr.hbm [resolvable:$true] %s173_s8 }
  0x1d   : > { %s488_s10 = sshra.s32 %s174_s8, 4  ;;  %s489_s10 = int_to_ptr.hbm [resolvable:$true] %s488_s10 }
  0x1e   : > { %s490_s11 = scalar_lea.hbm %s489_s10, 8  ;;  %p496_p4 = scmp.lt.s32.totalorder %s489_s10, %s853_s1 }
  0x1f   : > { %p491_p0 = scmp.ne.s32.totalorder %s489_s10, %s490_s11  ;;  %p497_p5 = scmp.lt.s32.totalorder %s495_s20, %s490_s11 }
  0x21   : > { %p493_p2 = pnand %p492_p1, %p491_p0  ;;  %p498_p7 = por %p497_p5, %p496_p4 }
  0x23   : > { %p494_p3 = pneg %p493_p2 }
  0x25   : > { %p499_p8 = pnand %p498_p7, %p494_p3 }
  0x27   : > { %502 = shalt.err (!%p499_p8)
}
  0x28   : > { %445 = dma.hbm_to_vmem [thread:$0]  (!%p726_p12), %s174_s8, 128, %s176_s7, %s737_s9  }
  0x29   : > { %p197_p9 = scmp.lt.s32.totalorder %s648_s15, 5  ;;  %s418_s27 = sshll.u32 %s724_s25, 1 }
  0x2a   : > { %s419_s30 = sshll.u32 %s648_s15, 1  ;;  %s148_s11 = scalar_lea.vmem [#allocation2], %s418_s27 }
  0x2b   : > { %p758_p0 = pnand %p422_p13, %p197_p9  ;;  %s152_s10 = scalar_lea.hbm %s844_s0, %s419_s30 }
  0x2c   : > { %s156_s17 = sshll.u32 %s148_s11, 4  ;;  %s154_s19 = sshll.u32 %s152_s10, 4  ;;  %s157_s17 = int_to_ptr.vmem [resolvable:$true] %s156_s17  ;;  %s155_s19 = int_to_ptr.hbm [resolvable:$true] %s154_s19 }
  0x2d   : > { %s145_s20 = scalar_lea.sflag [#allocation3], %s724_s25  ;;  %s518_s7 = sshra.s32 %s155_s19, 4  ;;  %s519_s7 = int_to_ptr.hbm [resolvable:$true] %s518_s7 }
  0x2e   : > { %s520_s8 = scalar_lea.hbm %s519_s7, 2  ;;  %s525_s1 = scalar_lea.hbm %s844_s0, 8 }
  0x2f   : > { %p521_p2 = scmp.ne.s32.totalorder %s519_s7, %s520_s8  ;;  %p526_p4 = scmp.lt.s32.totalorder %s519_s7, %s844_s0 }
  0x30   : > { %p527_p5 = scmp.lt.s32.totalorder %s525_s1, %s520_s8 }
  0x31   : > { %p523_p13 = pnand %p521_p2, %p492_p1 }
  0x32   : > { %p528_p7 = por %p527_p5, %p526_p4 }
  0x33   : > { %p524_p3 = pneg %p523_p13 }
  0x35   : > { %p529_p8 = pnand %p528_p7, %p524_p3 }
  0x37   : > { %532 = shalt.err (!%p529_p8)
}
  0x38   : > { %442 = dma.hbm_to_vmem [thread:$0]  (!%p726_p12), %s155_s19, 32, %s157_s17, %s145_s20  }
  0x39   : > { %s188_s10 = scalar_lea.hbm %s846_s2, %s648_s15  ;;  %s185_s11 = scalar_lea.vmem [#allocation7], %s724_s25 }
  0x3a   : > { %s192_s28 = sshll.u32 %s185_s11, 4  ;;  %s190_s29 = sshll.u32 %s188_s10, 4  ;;  %s193_s28 = int_to_ptr.vmem [resolvable:$true] %s192_s28  ;;  %s191_s29 = int_to_ptr.hbm [resolvable:$true] %s190_s29 }
  0x3b   : > { %s548_s7 = sshra.s32 %s191_s29, 4  ;;  %s555_s17 = scalar_lea.hbm %s846_s2, 4  ;;  %s549_s7 = int_to_ptr.hbm [resolvable:$true] %s548_s7 }
  0x3c   : > { %s550_s1 = scalar_lea.hbm %s549_s7, 1  ;;  %p556_p3 = scmp.lt.s32.totalorder %s549_s7, %s846_s2 }
  0x3d   : > { %p551_p9 = scmp.ne.s32.totalorder %s549_s7, %s550_s1  ;;  %p557_p4 = scmp.lt.s32.totalorder %s555_s17, %s550_s1 }
  0x3f   : > { %p553_p2 = pnand %p551_p9, %p492_p1  ;;  %p558_p5 = por %p557_p4, %p556_p3 }
  0x41   : > { %p554_p13 = pneg %p553_p2 }
  0x43   : > { %p559_p7 = pnand %p558_p5, %p554_p13 }
  0x45   : > { %562 = shalt.err (!%p559_p7)
}
  0x46   : > { %448 = dma.hbm_to_vmem [thread:$0]  (!%p726_p12), %s191_s29, 16, %s193_s28, %s737_s9  }
  0x47   : > { %201 = sbr.rel (%p758_p0) target bundleno = 213 (0xd5), region = 32  ;;  %s797_s25 = sand.u32 (!%p758_p0), 1, %s640_s13  }
  0x48   : > { %s423_s30 = sshll.u32 (!%p758_p0), %s797_s25, 1  ;;  %s204_s27 = scalar_lea.sflag (!%p758_p0), [#allocation3], %s797_s25 }
  0x49   : > { %s207_s6 = scalar_lea.vmem (!%p758_p0), [#allocation2], %s423_s30 }
  0x4c   : > { %623 = dma.done.wait (%p709_p6), %s204_s27, 32  }
  0x4d   : > { %625 = vsyncadd (%p709_p6), %s204_s27, 4294967264  ;;  %s213_s26 = sand.u32 1, %s691_s16   ;;  %s424_s9 = sshll.u32 %s797_s25, 3 }
  0x4e   : > { %s214_s4 = scalar_lea.sflag [#allocation6], %s213_s26  ;;  %s217_s10 = scalar_lea.vmem [#allocation5], %s424_s9 }
  0x4f   : > { %627 = dma.done.wait (%p709_p6), %s214_s4, 144  }
  0x50   : > { %629 = vsyncadd (%p709_p6), %s214_s4, 4294967152  ;;  %vm265_vm0 = vcmask 64512   ;;  %v260_v0 = vld [vmem:[%s217_s10] sm:$0xff]  ;;  %v259_v1 = vld [vmem:[%s207_s6] sm:$0x3]  ;;  %s226_s11 = scalar_lea.vmem [#allocation7], %s797_s25 }
  0x51   : > { %284 = vmatpush.msra.mxu0 %v260_v0  ;;  %s428_s28 = sshll.u32 %s691_s16, 1  ;;  %v487_v2 = vld [vmem:[%s226_s11] ss:$0 sm:$0xff]  ;;  %s258_s8 = scalar_lea.vmem [#allocation8], %s423_s30 }
  0x52   : > { %426 = vmatmul.msk.f32.vlgmr.msra.gmra.mxu0 %vm265_vm0, %v259_v1  ;;  %s301_s1 = scalar_lea.hbm %s847_s3, %s428_s28  ;;  %s303_s5 = sshll.u32 %s258_s8, 4  ;;  %s304_s5 = int_to_ptr.vmem [resolvable:$true] %s303_s5 }
  0x53   : > { %s305_s22 = sshll.u32 %s301_s1, 4  ;;  %s291_s17 = scalar_lea.sflag [#allocation4], %s797_s25  ;;  %s306_s22 = int_to_ptr.hbm [resolvable:$true] %s305_s22 }
  0x54   : > { %s592_s19 = sshra.s32 %s306_s22, 4  ;;  %s598_s6 = scalar_lea.hbm %s847_s3, 8  ;;  %s593_s19 = int_to_ptr.hbm [resolvable:$true] %s592_s19 }
  0x55   : > { %s594_s20 = scalar_lea.hbm %s593_s19, 2  ;;  %p599_p0 = scmp.lt.s32.totalorder %s593_s19, %s847_s3 }
  0x56   : > { %p595_p6 = scmp.ne.s32.totalorder %s593_s19, %s594_s20  ;;  %p600_p8 = scmp.lt.s32.totalorder %s598_s6, %s594_s20 }
  0x58   : > { %p596_p12 = pnand %p595_p6, %p715_p10  ;;  %p601_p9 = por %p600_p8, %p599_p0 }
  0x5a   : > { %p597_p1 = pneg %p596_p12 }
  0x5c   : > { %p602_p2 = pnand %p601_p9, %p597_p1 }
  0xcf   : > { %v286_v3 = vpop.f32.mrf.mxu0 }
  0xd0   : > { %v287_v4 = vadd.f32 %v487_v2, %v286_v3 }
  0xd2   : > { %289 = vst [vmem:[%s258_s8] sm:$0x3] %v287_v4 }
  0xd3   : > { %605 = shalt.err (!%p602_p2)
}
  0xd4   : > { %437 = dma.vmem_to_hbm [thread:$0]  (%p715_p10), %s304_s5, 32, %s306_s22, %s291_s17  }
  0xd5 PF: > { %p454_p13 = scmp.ge.s32.totalorder %s648_s15, 2  ;;  %s317_s25 = sand.u32 1, %s636_s12  }
  0xd6   : > { %s318_s9 = scalar_lea.sflag [#allocation4], %s317_s25 }
  0xd7   : > { %p450_p3 = pnand %p454_p13, %p719_p11 }
  0xd9   : > { %p451_p4 = pneg %p450_p3 }
  0xdb   : > { %631 = dma.done.wait (%p451_p4), %s318_s9, 32  }
  0xdc   : > { %633 = vsyncadd (%p451_p4), %s318_s9, 4294967264  ;;  %p19_p5 = scmp.ge.s32.totalorder %s695_s18, 6   ;;  %s855_s12 = smov %s640_s13 }
  0xdd   : > { %s856_s13 = smov %s644_s14  ;;  %s857_s14 = smov %s707_s21 }
  0xde   : > { %s858_s15 = smov %s695_s18  ;;  %21 = sbr.rel (!%p19_p5) target bundleno = 9 (0x9), region = 101 }
  0xe3   :  { %324 = vsyncpa [#allocation3], 1 }
  0xe4   :  { %326 = vsyncpa [#allocation3 + $0x1], 1 }
  0xe5   :  { %327 = vsyncpa [#allocation6], 1 }
  0xe6   :  { %329 = vsyncpa [#allocation6 + $0x1], 1 }
  0xe7   :  { %330 = vsyncpa [#allocation4], 1 }
  0xe8   :  { %332 = vsyncpa [#allocation4 + $0x1], 1 }

</bundles_post_ra>
